<compile_context>
chip_gen: v5e
topology: v5e:2x2
jax: 0.10.0
libtpu: 0.0.40
codegen_flags: <defaults>
</compile_context>

<pallas_src>
import functools

import jax
import jax.numpy as jnp
from jax.experimental import pallas as pl
from jax.experimental.pallas import tpu as pltpu


def _layernorm(h, gamma, beta, eps=1e-5):
    mu = jnp.mean(h, axis=-1, keepdims=True)
    var = jnp.mean((h - mu) ** 2, axis=-1, keepdims=True)
    return (h - mu) * jax.lax.rsqrt(var + eps) * gamma + beta


def controller_kernel(
    progress_ref,          # SMEM (1,) f32
    x_ref,                 # VMEM (1, input_dim) f32
    slab_ref,              # VMEM (168, 128) f32   -- single merged parameter slab
    out_ref,               # VMEM (1, 128)   f32   -- packed outputs
    *,
    input_dim, hidden_dim, num_strategies,
):
    half = hidden_dim // 2
    ns = num_strategies
    ih = input_dim + hidden_dim           # start row of fused head weights
    v = ih + hidden_dim                   # start row of the "vector" rows

    x = x_ref[...].astype(jnp.float32)                               # (1, in)

    # --- encoder: Linear -> LayerNorm -> ReLU -> Linear -> LayerNorm -> ReLU
    w1 = slab_ref[0:input_dim, 0:hidden_dim]                          # (in, hid)
    w2 = slab_ref[input_dim:ih, 0:hidden_dim]                         # (hid, hid)

    h = (jnp.dot(x, w1, preferred_element_type=jnp.float32)
         + slab_ref[v + 0:v + 1, 0:hidden_dim])
    h = _layernorm(h, slab_ref[v + 1:v + 2, 0:hidden_dim],
                   slab_ref[v + 2:v + 3, 0:hidden_dim])
    h = jnp.maximum(h, 0.0)

    h = (jnp.dot(h, w2, preferred_element_type=jnp.float32)
         + slab_ref[v + 3:v + 4, 0:hidden_dim])
    h = _layernorm(h, slab_ref[v + 4:v + 5, 0:hidden_dim],
                   slab_ref[v + 5:v + 6, 0:hidden_dim])
    encoded = jnp.maximum(h, 0.0)                                     # (1, hid)

    # --- one fused lane-dense head matmul: [wg | wt1h | wv] + fused bias row
    heads_w = slab_ref[ih:ih + hidden_dim, :]                         # (hid, 128)
    heads = (jnp.dot(encoded, heads_w, preferred_element_type=jnp.float32)
             + slab_ref[v + 6:v + 7, :])                              # (1, 128)
    # lanes 0:ns        = weight_generator raw output
    # lanes ns:ns+half  = temperature-predictor layer-1 (encoded part + bt1)
    # lane  ns+half     = value_predictor output

    lane = jax.lax.broadcasted_iota(jnp.int32, (1, 128), 1)
    is_w = lane < ns

    # --- softmax max, hoisted off the temperature dependency (T > 0 always)
    raw_m = jnp.where(is_w, heads, jnp.float32(-1e30))                # (1, 128)
    m = jnp.max(raw_m, axis=-1, keepdims=True)                        # (1, 1)

    # --- temperature predictor on cat([encoded, progress]):
    #     concat+matmul == encoded @ W[:hid] + progress * W[hid]  (wt1p row).
    #     Done lane-dense over 128 lanes: wt1p/wt2 rows are zero outside
    #     lanes ns:ns+half, so out-of-range lanes contribute nothing.
    p = progress_ref[0]
    t128 = jnp.maximum(heads + p * slab_ref[v + 7:v + 8, :], 0.0)     # (1, 128)
    t2 = (jnp.sum(t128 * slab_ref[v + 8:v + 9, :], axis=-1, keepdims=True)
          + slab_ref[v + 9:v + 10, 0:1])                              # (1, 1)

    sig = 0.5 * (1.0 + jnp.tanh(0.5 * t2))                            # one EUP op
    temperature = 0.1 + 1.9 * sig                                     # (1, 1)

    # --- softmax(raw / temperature); exact divide -> weights sum to 1
    inv_t = pl.reciprocal(temperature, approx=True)                   # EUP slot
    e = jnp.exp((raw_m - m) * inv_t)                                  # (1, 128)
    weights128 = e / jnp.sum(e, axis=-1, keepdims=True)

    # --- compose the full (1,128) output in registers; one unmasked store.
    packed = jnp.where(is_w, weights128,
                       jnp.where(lane == ns, temperature, heads))
    out_ref[...] = packed


def pack_params(params, num_strategies, input_dim=24, hidden_dim=64):
    """Pack the 17 parameter tensors into ONE lane-aligned slab (done once)."""
    half = hidden_dim // 2
    ns = num_strategies
    ih = input_dim + hidden_dim
    v = ih + hidden_dim
    rows = v + 16
    rows = ((rows + 7) // 8) * 8                       # sublane-align (168 already is)

    slab = jnp.zeros((rows, 128), jnp.float32)
    # encoder weights
    slab = slab.at[0:input_dim, 0:hidden_dim].set(params["w1"])
    slab = slab.at[input_dim:ih, 0:hidden_dim].set(params["w2"])
    # fused head weights  [wg | wt1h | wv | 0-pad]
    slab = slab.at[ih:v, 0:ns].set(params["wg"])
    slab = slab.at[ih:v, ns:ns + half].set(params["wt1h"])
    slab = slab.at[ih:v, ns + half:ns + half + 1].set(params["wv"])
    # vector rows
    slab = slab.at[v + 0, 0:hidden_dim].set(params["b1"][0])
    slab = slab.at[v + 1, 0:hidden_dim].set(params["g1"][0])
    slab = slab.at[v + 2, 0:hidden_dim].set(params["be1"][0])
    slab = slab.at[v + 3, 0:hidden_dim].set(params["b2"][0])
    slab = slab.at[v + 4, 0:hidden_dim].set(params["g2"][0])
    slab = slab.at[v + 5, 0:hidden_dim].set(params["be2"][0])
    slab = slab.at[v + 6, 0:ns].set(params["bg"][0])                  # fused heads bias
    slab = slab.at[v + 6, ns:ns + half].set(params["bt1"][0])
    slab = slab.at[v + 6, ns + half].set(params["bv"][0, 0])
    slab = slab.at[v + 7, ns:ns + half].set(params["wt1p"][0])        # progress row, temp L1
    slab = slab.at[v + 8, ns:ns + half].set(params["wt2"][:, 0])      # temp L2 weight row
    slab = slab.at[v + 9, 0].set(params["bt2"][0, 0])                 # temp L2 bias

    return {"slab": slab, "dims": (input_dim, hidden_dim, ns)}


def hypernetwork_controller_forward(packed, state, training_progress):
    """state: (1, input_dim) f32; training_progress: python float or () f32."""
    input_dim, hidden_dim, num_strategies = packed["dims"]
    half = hidden_dim // 2
    progress = jnp.asarray(training_progress, jnp.float32).reshape(1)

    vmem = pl.BlockSpec(memory_space=pltpu.MemorySpace.VMEM)
    smem = pl.BlockSpec(memory_space=pltpu.MemorySpace.SMEM)

    kernel = functools.partial(
        controller_kernel,
        input_dim=input_dim, hidden_dim=hidden_dim, num_strategies=num_strategies)

    out = pl.pallas_call(
        kernel,
        out_shape=jax.ShapeDtypeStruct((1, 128), jnp.float32),
        in_specs=[smem, vmem, vmem],
        out_specs=vmem,
    )(progress, state, packed["slab"])

    strategy_weights = out[:, 0:num_strategies]
    temperature = out[:, num_strategies:num_strategies + 1]
    value = out[:, num_strategies + half:num_strategies + half + 1]
    return strategy_weights, temperature, value


def init_params(key, strategies, input_dim=24, hidden_dim=64):
    """Deterministic init mirroring the PyTorch _init_weights: kaiming_normal_
    (relu gain, fan_in) on Linear weights, zero biases, LayerNorm gamma=1/beta=0,
    and weight_generator.bias[index('S_U') or 0] = 0.5."""
    num_strategies = len(strategies)
    half = hidden_dim // 2
    keys = jax.random.split(key, 6)

    def kaiming(k, fan_in, fan_out):
        std = (2.0 / fan_in) ** 0.5
        return std * jax.random.normal(k, (fan_in, fan_out), jnp.float32)  # (in, out)

    u_idx = strategies.index("S_U") if "S_U" in strategies else 0
    bg = jnp.zeros((1, num_strategies), jnp.float32).at[0, u_idx].set(0.5)

    wt1 = kaiming(keys[3], hidden_dim + 1, half)  # acts on cat([encoded, progress])

    return {
        "w1": kaiming(keys[0], input_dim, hidden_dim),
        "b1": jnp.zeros((1, hidden_dim), jnp.float32),
        "g1": jnp.ones((1, hidden_dim), jnp.float32),
        "be1": jnp.zeros((1, hidden_dim), jnp.float32),
        "w2": kaiming(keys[1], hidden_dim, hidden_dim),
        "b2": jnp.zeros((1, hidden_dim), jnp.float32),
        "g2": jnp.ones((1, hidden_dim), jnp.float32),
        "be2": jnp.zeros((1, hidden_dim), jnp.float32),
        "wg": kaiming(keys[2], hidden_dim, num_strategies),
        "bg": bg,
        "wt1h": wt1[:hidden_dim, :],
        "wt1p": wt1[hidden_dim:, :],            # (1, hidden//2) row for progress
        "bt1": jnp.zeros((1, half), jnp.float32),
        "wt2": kaiming(keys[4], half, 1),
        "bt2": jnp.zeros((1, 1), jnp.float32),
        "wv": kaiming(keys[5], hidden_dim, 1),
        "bv": jnp.zeros((1, 1), jnp.float32),
    }


def reference_forward(params, state, training_progress):
    """Pure-JAX reference (mirrors the PyTorch forward)."""
    def ln(h, g, b, eps=1e-5):
        mu = jnp.mean(h, -1, keepdims=True)
        var = jnp.mean((h - mu) ** 2, -1, keepdims=True)
        return (h - mu) / jnp.sqrt(var + eps) * g + b

    h = jnp.maximum(ln(state @ params["w1"] + params["b1"], params["g1"], params["be1"]), 0.0)
    enc = jnp.maximum(ln(h @ params["w2"] + params["b2"], params["g2"], params["be2"]), 0.0)
    raw = enc @ params["wg"] + params["bg"]
    temp_in = jnp.concatenate([enc, jnp.full((1, 1), training_progress, jnp.float32)], axis=1)
    wt1 = jnp.concatenate([params["wt1h"], params["wt1p"]], axis=0)
    t = jnp.maximum(temp_in @ wt1 + params["bt1"], 0.0)
    t = t @ params["wt2"] + params["bt2"]
    temperature = 0.1 + 1.9 * jax.nn.sigmoid(t)
    weights = jax.nn.softmax(raw / temperature, axis=-1)
    value = enc @ params["wv"] + params["bv"]
    return weights, temperature, value


if __name__ == "__main__":
    strategies = ["S_U", "S_A", "S_B", "S_C"]
    input_dim, hidden_dim = 24, 64
    training_progress = 0.3

    key = jax.random.PRNGKey(0)
    pkey, skey = jax.random.split(key)
    params = init_params(pkey, strategies, input_dim, hidden_dim)
    packed = pack_params(params, len(strategies), input_dim, hidden_dim)
    state = jax.random.normal(skey, (1, input_dim), jnp.float32)

    # TODO(synk): the torch try/except fallback path (uniform weights on runtime
    # exception) has no kernel equivalent; only the nominal forward is implemented.
    fwd = jax.jit(functools.partial(hypernetwork_controller_forward, packed))
    w, temp, val = fwd(state, training_progress)
    jax.block_until_ready((w, temp, val))

    w_ref, t_ref, v_ref = reference_forward(params, state, training_progress)
    # approx reciprocal (1/T only) + HW tanh => relaxed tolerance.
    assert jnp.allclose(w, w_ref, atol=2e-3), (w, w_ref)
    assert jnp.allclose(temp, t_ref, atol=2e-3), (temp, t_ref)
    assert jnp.allclose(val, v_ref, atol=2e-3), (val, v_ref)
    assert w.shape == (1, len(strategies)) and temp.shape == (1, 1) and val.shape == (1, 1)
    # exact divide in the kernel softmax -> weights form a (near-)exact simplex
    assert abs(float(jnp.sum(w)) - 1.0) < 1e-5

    print("KERNEL_OK")
</pallas_src>

<mosaic_0001>
module attributes {stable_mosaic.version = 11 : i64} {
  func.func @controller_kernel(%arg0: memref<1xf32, #tpu.memory_space<smem>>, %arg1: memref<1x24xf32, #tpu.memory_space<vmem>>, %arg2: memref<168x128xf32, #tpu.memory_space<vmem>>, %arg3: memref<1x128xf32, #tpu.memory_space<vmem>>) attributes {dimension_semantics = [], scalar_prefetch = 0 : i64, scratch_operands = 0 : i64, tpu.core_type = #tpu.core_type<tc>} {
    %c0 = arith.constant 0 : index
    %c0_0 = arith.constant 0 : index
    %0 = vector.load %arg1[%c0, %c0_0] : memref<1x24xf32, #tpu.memory_space<vmem>>, vector<1x24xf32>
    %c0_1 = arith.constant 0 : index
    %c0_2 = arith.constant 0 : index
    %1 = vector.load %arg2[%c0_1, %c0_2] : memref<168x128xf32, #tpu.memory_space<vmem>>, vector<24x64xf32>
    %c24 = arith.constant 24 : index
    %c0_3 = arith.constant 0 : index
    %2 = vector.load %arg2[%c24, %c0_3] : memref<168x128xf32, #tpu.memory_space<vmem>>, vector<64x64xf32>
    %cst = arith.constant dense<0.000000e+00> : vector<1x64xf32>
    %3 = tpu.matmul %0, %1, %cst {dimension_numbers = #tpu.dot_dimension_numbers<[1], [0], [0], [1], [0, 0, 1, 1], [], []>} : vector<1x24xf32>, vector<24x64xf32>, vector<1x64xf32> -> vector<1x64xf32>
    %c152 = arith.constant 152 : index
    %c0_4 = arith.constant 0 : index
    %4 = vector.load %arg2[%c152, %c0_4] : memref<168x128xf32, #tpu.memory_space<vmem>>, vector<1x64xf32>
    %5 = arith.addf %3, %4 : vector<1x64xf32>
    %c153 = arith.constant 153 : index
    %c0_5 = arith.constant 0 : index
    %6 = vector.load %arg2[%c153, %c0_5] : memref<168x128xf32, #tpu.memory_space<vmem>>, vector<1x64xf32>
    %c154 = arith.constant 154 : index
    %c0_6 = arith.constant 0 : index
    %7 = vector.load %arg2[%c154, %c0_6] : memref<168x128xf32, #tpu.memory_space<vmem>>, vector<1x64xf32>
    %cst_7 = arith.constant dense<0.000000e+00> : vector<1xf32>
    %8 = vector.multi_reduction <add>, %5, %cst_7 [1] : vector<1x64xf32> to vector<1xf32>
    %9 = vector.shape_cast %8 : vector<1xf32> to vector<1x1xf32>
    %cst_8 = arith.constant 6.400000e+01 : f32
    %10 = vector.broadcast %cst_8 : f32 to vector<1x1xf32>
    %11 = arith.divf %9, %10 : vector<1x1xf32>
    %12 = vector.broadcast %11 : vector<1x1xf32> to vector<1x64xf32>
    %13 = arith.subf %5, %12 : vector<1x64xf32>
    %14 = arith.mulf %13, %13 : vector<1x64xf32>
    %cst_9 = arith.constant dense<0.000000e+00> : vector<1xf32>
    %15 = vector.multi_reduction <add>, %14, %cst_9 [1] : vector<1x64xf32> to vector<1xf32>
    %16 = vector.shape_cast %15 : vector<1xf32> to vector<1x1xf32>
    %cst_10 = arith.constant 6.400000e+01 : f32
    %17 = vector.broadcast %cst_10 : f32 to vector<1x1xf32>
    %18 = arith.divf %16, %17 : vector<1x1xf32>
    %19 = vector.broadcast %11 : vector<1x1xf32> to vector<1x64xf32>
    %20 = arith.subf %5, %19 : vector<1x64xf32>
    %cst_11 = arith.constant 9.99999974E-6 : f32
    %21 = vector.broadcast %cst_11 : f32 to vector<1x1xf32>
    %22 = arith.addf %18, %21 : vector<1x1xf32>
    %23 = math.rsqrt %22 : vector<1x1xf32>
    %24 = vector.broadcast %23 : vector<1x1xf32> to vector<1x64xf32>
    %25 = arith.mulf %20, %24 : vector<1x64xf32>
    %26 = arith.mulf %25, %6 : vector<1x64xf32>
    %27 = arith.addf %26, %7 : vector<1x64xf32>
    %cst_12 = arith.constant 0.000000e+00 : f32
    %28 = vector.broadcast %cst_12 : f32 to vector<1x64xf32>
    %29 = arith.maximumf %27, %28 : vector<1x64xf32>
    %cst_13 = arith.constant dense<0.000000e+00> : vector<1x64xf32>
    %30 = tpu.matmul %29, %2, %cst_13 {dimension_numbers = #tpu.dot_dimension_numbers<[1], [0], [0], [1], [0, 0, 1, 1], [], []>} : vector<1x64xf32>, vector<64x64xf32>, vector<1x64xf32> -> vector<1x64xf32>
    %c155 = arith.constant 155 : index
    %c0_14 = arith.constant 0 : index
    %31 = vector.load %arg2[%c155, %c0_14] : memref<168x128xf32, #tpu.memory_space<vmem>>, vector<1x64xf32>
    %32 = arith.addf %30, %31 : vector<1x64xf32>
    %c156 = arith.constant 156 : index
    %c0_15 = arith.constant 0 : index
    %33 = vector.load %arg2[%c156, %c0_15] : memref<168x128xf32, #tpu.memory_space<vmem>>, vector<1x64xf32>
    %c157 = arith.constant 157 : index
    %c0_16 = arith.constant 0 : index
    %34 = vector.load %arg2[%c157, %c0_16] : memref<168x128xf32, #tpu.memory_space<vmem>>, vector<1x64xf32>
    %cst_17 = arith.constant dense<0.000000e+00> : vector<1xf32>
    %35 = vector.multi_reduction <add>, %32, %cst_17 [1] : vector<1x64xf32> to vector<1xf32>
    %36 = vector.shape_cast %35 : vector<1xf32> to vector<1x1xf32>
    %cst_18 = arith.constant 6.400000e+01 : f32
    %37 = vector.broadcast %cst_18 : f32 to vector<1x1xf32>
    %38 = arith.divf %36, %37 : vector<1x1xf32>
    %39 = vector.broadcast %38 : vector<1x1xf32> to vector<1x64xf32>
    %40 = arith.subf %32, %39 : vector<1x64xf32>
    %41 = arith.mulf %40, %40 : vector<1x64xf32>
    %cst_19 = arith.constant dense<0.000000e+00> : vector<1xf32>
    %42 = vector.multi_reduction <add>, %41, %cst_19 [1] : vector<1x64xf32> to vector<1xf32>
    %43 = vector.shape_cast %42 : vector<1xf32> to vector<1x1xf32>
    %cst_20 = arith.constant 6.400000e+01 : f32
    %44 = vector.broadcast %cst_20 : f32 to vector<1x1xf32>
    %45 = arith.divf %43, %44 : vector<1x1xf32>
    %46 = vector.broadcast %38 : vector<1x1xf32> to vector<1x64xf32>
    %47 = arith.subf %32, %46 : vector<1x64xf32>
    %cst_21 = arith.constant 9.99999974E-6 : f32
    %48 = vector.broadcast %cst_21 : f32 to vector<1x1xf32>
    %49 = arith.addf %45, %48 : vector<1x1xf32>
    %50 = math.rsqrt %49 : vector<1x1xf32>
    %51 = vector.broadcast %50 : vector<1x1xf32> to vector<1x64xf32>
    %52 = arith.mulf %47, %51 : vector<1x64xf32>
    %53 = arith.mulf %52, %33 : vector<1x64xf32>
    %54 = arith.addf %53, %34 : vector<1x64xf32>
    %cst_22 = arith.constant 0.000000e+00 : f32
    %55 = vector.broadcast %cst_22 : f32 to vector<1x64xf32>
    %56 = arith.maximumf %54, %55 : vector<1x64xf32>
    %c88 = arith.constant 88 : index
    %c0_23 = arith.constant 0 : index
    %57 = vector.load %arg2[%c88, %c0_23] : memref<168x128xf32, #tpu.memory_space<vmem>>, vector<64x128xf32>
    %cst_24 = arith.constant dense<0.000000e+00> : vector<1x128xf32>
    %58 = tpu.matmul %56, %57, %cst_24 {dimension_numbers = #tpu.dot_dimension_numbers<[1], [0], [0], [1], [0, 0, 1, 1], [], []>} : vector<1x64xf32>, vector<64x128xf32>, vector<1x128xf32> -> vector<1x128xf32>
    %c158 = arith.constant 158 : index
    %c0_25 = arith.constant 0 : index
    %59 = vector.load %arg2[%c158, %c0_25] : memref<168x128xf32, #tpu.memory_space<vmem>>, vector<1x128xf32>
    %60 = arith.addf %58, %59 : vector<1x128xf32>
    %61 = tpu.iota {dimensions = array<i32: 1>} : vector<1x128xi32>
    %c4_i32 = arith.constant 4 : i32
    %62 = vector.broadcast %c4_i32 : i32 to vector<1x128xi32>
    %63 = arith.cmpi slt, %61, %62 : vector<1x128xi32>
    %cst_26 = arith.constant -1.000000e+30 : f32
    %64 = vector.broadcast %cst_26 : f32 to vector<1x128xf32>
    %65 = arith.select %63, %60, %64 : vector<1x128xi1>, vector<1x128xf32>
    %cst_27 = arith.constant dense<0xFF800000> : vector<1xf32>
    %66 = vector.multi_reduction <maximumf>, %65, %cst_27 [1] : vector<1x128xf32> to vector<1xf32>
    %67 = vector.shape_cast %66 : vector<1xf32> to vector<1x1xf32>
    %c0_28 = arith.constant 0 : index
    %68 = memref.load %arg0[%c0_28] : memref<1xf32, #tpu.memory_space<smem>>
    %c159 = arith.constant 159 : index
    %c0_29 = arith.constant 0 : index
    %69 = vector.load %arg2[%c159, %c0_29] : memref<168x128xf32, #tpu.memory_space<vmem>>, vector<1x128xf32>
    %70 = vector.broadcast %68 : f32 to vector<1x128xf32>
    %71 = arith.mulf %70, %69 : vector<1x128xf32>
    %72 = arith.addf %60, %71 : vector<1x128xf32>
    %cst_30 = arith.constant 0.000000e+00 : f32
    %73 = vector.broadcast %cst_30 : f32 to vector<1x128xf32>
    %74 = arith.maximumf %72, %73 : vector<1x128xf32>
    %c160 = arith.constant 160 : index
    %c0_31 = arith.constant 0 : index
    %75 = vector.load %arg2[%c160, %c0_31] : memref<168x128xf32, #tpu.memory_space<vmem>>, vector<1x128xf32>
    %76 = arith.mulf %74, %75 : vector<1x128xf32>
    %cst_32 = arith.constant dense<0.000000e+00> : vector<1xf32>
    %77 = vector.multi_reduction <add>, %76, %cst_32 [1] : vector<1x128xf32> to vector<1xf32>
    %78 = vector.shape_cast %77 : vector<1xf32> to vector<1x1xf32>
    %c161 = arith.constant 161 : index
    %c0_33 = arith.constant 0 : index
    %79 = vector.load %arg2[%c161, %c0_33] : memref<168x128xf32, #tpu.memory_space<vmem>>, vector<1x1xf32>
    %80 = arith.addf %78, %79 : vector<1x1xf32>
    %cst_34 = arith.constant 5.000000e-01 : f32
    %81 = vector.broadcast %cst_34 : f32 to vector<1x1xf32>
    %82 = arith.mulf %81, %80 : vector<1x1xf32>
    %83 = math.tanh %82 : vector<1x1xf32>
    %cst_35 = arith.constant 1.000000e+00 : f32
    %84 = vector.broadcast %cst_35 : f32 to vector<1x1xf32>
    %85 = arith.addf %84, %83 : vector<1x1xf32>
    %cst_36 = arith.constant 5.000000e-01 : f32
    %86 = vector.broadcast %cst_36 : f32 to vector<1x1xf32>
    %87 = arith.mulf %86, %85 : vector<1x1xf32>
    %cst_37 = arith.constant 1.900000e+00 : f32
    %88 = vector.broadcast %cst_37 : f32 to vector<1x1xf32>
    %89 = arith.mulf %88, %87 : vector<1x1xf32>
    %cst_38 = arith.constant 1.000000e-01 : f32
    %90 = vector.broadcast %cst_38 : f32 to vector<1x1xf32>
    %91 = arith.addf %90, %89 : vector<1x1xf32>
    %92 = tpu.reciprocal %91 {approx = true} : vector<1x1xf32> -> vector<1x1xf32>
    %93 = vector.broadcast %67 : vector<1x1xf32> to vector<1x128xf32>
    %94 = arith.subf %65, %93 : vector<1x128xf32>
    %95 = vector.broadcast %92 : vector<1x1xf32> to vector<1x128xf32>
    %96 = arith.mulf %94, %95 : vector<1x128xf32>
    %97 = math.exp %96 : vector<1x128xf32>
    %cst_39 = arith.constant dense<0.000000e+00> : vector<1xf32>
    %98 = vector.multi_reduction <add>, %97, %cst_39 [1] : vector<1x128xf32> to vector<1xf32>
    %99 = vector.shape_cast %98 : vector<1xf32> to vector<1x1xf32>
    %100 = vector.broadcast %99 : vector<1x1xf32> to vector<1x128xf32>
    %101 = arith.divf %97, %100 : vector<1x128xf32>
    %c4_i32_40 = arith.constant 4 : i32
    %102 = vector.broadcast %c4_i32_40 : i32 to vector<1x128xi32>
    %103 = arith.cmpi eq, %61, %102 : vector<1x128xi32>
    %104 = vector.shape_cast %91 : vector<1x1xf32> to vector<1x1xf32>
    %105 = vector.broadcast %104 : vector<1x1xf32> to vector<1x128xf32>
    %106 = arith.select %103, %105, %60 : vector<1x128xi1>, vector<1x128xf32>
    %107 = arith.select %63, %101, %106 : vector<1x128xi1>, vector<1x128xf32>
    %c0_41 = arith.constant 0 : index
    %c0_42 = arith.constant 0 : index
    %108 = vector.load %arg3[%c0_41, %c0_42] : memref<1x128xf32, #tpu.memory_space<vmem>>, vector<1x128xf32>
    tpu.vector_store %arg3[%c0_41, %c0_42], %107 {strides = array<i32>} : memref<1x128xf32, #tpu.memory_space<vmem>>, vector<1x128xf32>,
    return
  }
}

</mosaic_0001>

<bundles_post_ra>
// kernel: hypernetwork_controller_forward.1
= control target key start
LH: loop header
LB: loop body
LE: loop exit
PB: predicated region body
PF: predicated region fallthrough
CT: control target
= control target key end

     0   :  { %9 = vsyncpa [#allocation4], 0  ;;  %s306_s15 = smov [#allocation3]   ;;  %s307_s17 = smov 128   ;;  %s360_s0 = inlined_call_operand.<no memory space> [shape: f32[1], index: 0, kind: input, shape index: {}]   ;;  %s361_s1 = inlined_call_operand.vmem [shape: f32[1,24], index: 1, kind: input, shape index: {}]   ;;  %s362_s2 = inlined_call_operand.hbm [shape: f32[168,128], index: 2, kind: input, shape index: {}]   ;;  %s363_s3 = inlined_call_operand.vmem [shape: f32[1,128], index: 3, kind: output, shape index: {}]  }
   0x1   :  { %s18_s14 = sshll.u32 %s362_s2, 4  ;;  %s20_s16 = sshll.u32 %s306_s15, 4  ;;  %s19_s14 = int_to_ptr.hbm [resolvable:$true] %s18_s14  ;;  %s21_s16 = int_to_ptr.vmem [resolvable:$true] %s20_s16 }
   0x2   :  { %s308_s18 = smov 8  }
   0x3   :  { %26 = dma.hbm_to_vmem [thread:$0]  %s19_s14, 2688, %s21_s16, [#allocation4], %s307_s17, %s307_s17, %s308_s18  }
   0x4   :  { %304 = dma.done.wait [#allocation4], 2688  }
   0x5   :  { %305 = vsyncadd [#allocation4], 4294964608  ;;  %v34_v0 = vld [vmem:[#allocation3 + $0x10] sm:$0xff]  ;;  %v33_v1 = vld [vmem:[#allocation3 + $0x8] sm:$0xff]  ;;  %vm44_vm0 = vcmask 195584   ;;  %vm70_vm1 = vcmask 516096  }
   0x6   :  { %61 = vmatpush.msra.mxu0 %v34_v0  ;;  %v32_v2 = vld [vmem:[#allocation3] sm:$0xff]  ;;  %v43_v4 = vld [vmem:[#allocation3 + $0x98] sm:$0x1]  ;;  %v309_v8 = vmov 64.0   ;;  %v42_v20 = vld [vmem:[#allocation3 + $0x50] sm:$0xff]  ;;  %vm104_vm6 = vcmask 523264  }
   0x7   :  { %v31_v3 = vld [vmem:[%s361_s1] sm:$0x1]  ;;  %266 = vrcp.f32 %v309_v8  ;;  %116 = vmatpush.msra.mxu1 %v42_v20  ;;  %v41_v21 = vld [vmem:[#allocation3 + $0x48] sm:$0xff]  ;;  %v39_v23 = vld [vmem:[#allocation3 + $0x38] sm:$0xff]  ;;  %v187_v20 = vlaneseq  ;;  %vm191_vm10 = vcmask 1040384  }
   0x8   :  { %62 = vmatpush.msra.mxu0 %v33_v1  ;;  %v40_v22 = vld [vmem:[#allocation3 + $0x40] sm:$0xff]  ;;  %v38_v24 = vld [vmem:[#allocation3 + $0x30] sm:$0xff]  ;;  %v37_v25 = vld [vmem:[#allocation3 + $0x28] sm:$0xff] }
   0x9   :  { %117 = vmatpush.msra.mxu1 %v41_v21  ;;  %v36_v26 = vld [vmem:[#allocation3 + $0x20] sm:$0xff]  ;;  %v35_v27 = vld [vmem:[#allocation3 + $0x18] sm:$0xff]  ;;  %v162_v53 = vld [vmem:[#allocation3 + $0x90] sm:$0xff] }
   0xa   :  { %63 = vmatpush.msra.mxu0 %v32_v2  ;;  %v68_v38 = vld [vmem:[#allocation3 + $0x99] sm:$0x1]  ;;  %v69_v40 = vld [vmem:[#allocation3 + $0x9a] sm:$0x1]  ;;  %v103_v44 = vld [vmem:[#allocation3 + $0x9b] sm:$0x1]  ;;  %175 = vmatpush.msra.mxu2 %v162_v53 }
   0xb   :  { %256 = vmatmul.msk.f32.vlgmr.msra.gmra.mxu0 %vm44_vm0, %v31_v3  ;;  %118 = vmatpush.msra.mxu1 %v40_v22  ;;  %v161_v54 = vld [vmem:[#allocation3 + $0x88] sm:$0xff]  ;;  %v160_v55 = vld [vmem:[#allocation3 + $0x80] sm:$0xff]  ;;  %v159_v56 = vld [vmem:[#allocation3 + $0x78] sm:$0xff] }
   0xc   :  { %176 = vmatpush.msra.mxu2 %v161_v54  ;;  %v158_v57 = vld [vmem:[#allocation3 + $0x70] sm:$0xff]  ;;  %v157_v58 = vld [vmem:[#allocation3 + $0x68] sm:$0xff]  ;;  %v156_v59 = vld [vmem:[#allocation3 + $0x60] sm:$0xff] }
   0xd   :  { %v267_v9 = vpop.eup %266  ;;  %119 = vmatpush.msra.mxu1 %v39_v23  ;;  %v155_v60 = vld [vmem:[#allocation3 + $0x58] sm:$0xff]  ;;  %v201_v21 = vld [vmem:[#allocation3 + $0xa0] sm:$0x1] }
   0xe   :  { %v75_v10 = vmul.f32 64.0, %v267_v9  ;;  %vm79_vm2 = vweird.f32 %v267_v9  ;;  %177 = vmatpush.msra.mxu2 %v160_v55 }
   0xf   :  { %120 = vmatpush.msra.mxu1 %v38_v24  ;;  %v188_v24 = vand.u32 127, %v187_v20 }
  0x10   :  { %v76_v11 = vsub.f32 1.0, %v75_v10  ;;  %178 = vmatpush.msra.mxu2 %v159_v56 }
  0x11   :  { %121 = vmatpush.msra.mxu1 %v37_v25  ;;  %vm189_vm11 = vcmp.lt.s32.totalorder %v188_v24, 4  ;;  %vm242_vm15 = vcmp.eq.s32.totalorder %v188_v24, 4 }
  0x12   :  { %v77_v12 = vmul.f32 %v267_v9, %v76_v11  ;;  %179 = vmatpush.msra.mxu2 %v158_v57 }
  0x13   :  { %122 = vmatpush.msra.mxu1 %v36_v26 }
  0x14   :  { %v78_v13 = vadd.f32 %v267_v9, %v77_v12  ;;  %180 = vmatpush.msra.mxu2 %v157_v58 }
  0x15   :  { %123 = vmatpush.msra.mxu1 %v35_v27 }
  0x16   :  { %v338_v14 = vsel %vm79_vm2, %v267_v9, %v78_v13  ;;  %181 = vmatpush.msra.mxu2 %v156_v59  ;;  %v129_v9 = vld [vmem:[#allocation3 + $0x9d] sm:$0x1]  ;;  %v196_v13 = vld [vmem:[#allocation3 + $0x9f] sm:$0x1] }
  0x18   :  { %182 = vmatpush.msra.mxu2 %v155_v60 }
  0x88   :  { %v65_v5 = vpop.f32.mrf.mxu0 }
  0x89   :  { %v66_v6 = vadd.f32 %v65_v5, %v43_v4 }
  0x8b   :  { %v71_v7 = vsel %vm70_vm1, %v66_v6, 0.0 }
  0x8c   :  { %72 = vadd.xlane.f32.xlu0 %v71_v7  ;;  %v128_v7 = vld [vmem:[#allocation3 + $0x9c] sm:$0x1] }
  0xff   :  { %v73_v15 = vpop.xlane.xlu0 %72 }
 0x100   :  { %v81_v16 = vmul.f32 %v338_v14, %v73_v15  ;;  %v163_v15 = vld [vmem:[#allocation3 + $0x9e] sm:$0x1] }
 0x102   :  { %v82_v17 = vsub.f32 %v66_v6, %v81_v16 }
 0x104   :  { %v83_v18 = vmul.f32 %v82_v17, %v82_v17 }
 0x106   :  { %v84_v19 = vsel %vm70_vm1, %v83_v18, 0.0 }
 0x107   :  { %85 = vadd.xlane.f32.xlu0 %v84_v19 }
 0x17a   :  { %v86_v28 = vpop.xlane.xlu0 %85 }
 0x17b   :  { %v87_v29 = vmul.f32 %v86_v28, %v338_v14  ;;  %v310_v28 = vmov 0  }
 0x17c   :  { %265 = vset.pattern.permute.xlu2 %v310_v28  ;;  %264 = vset.pattern.permute.xlu0 %v310_v28 }
 0x17d   :  { %v88_v30 = vadd.f32 1e-05, %v87_v29  ;;  %v206_v29 = vld [vmem:[#allocation3 + $0xa1] sm:$0x1] }
 0x17f   :  { %268 = vrsqrt.f32 %v88_v30  ;;  %vm95_vm4 = vweird.f32 %v88_v30 }
 0x185   :  { %v269_v31 = vpop.eup %268 }
 0x186   :  { %v90_v32 = vmul.f32 %v269_v31, %v88_v30  ;;  %vm96_vm3 = vweird.f32 %v269_v31 }
 0x187   :  { %vm97_vm5 = vmor %vm95_vm4, %vm96_vm3 }
 0x188   :  { %v91_v33 = vmul.f32 %v269_v31, %v90_v32 }
 0x18a   :  { %v92_v34 = vmul.f32 0.5, %v91_v33 }
 0x18c   :  { %v93_v35 = vsub.f32 1.5, %v92_v34 }
 0x18e   :  { %v94_v36 = vmul.f32 %v269_v31, %v93_v35 }
 0x190   :  { %v98_v37 = vsel %vm97_vm5, %v269_v31, %v94_v36 }
 0x191   :  { %v99_v39 = vmul.f32 %v98_v37, %v82_v17 }
 0x193   :  { %v100_v41 = vmul.f32 %v99_v39, %v68_v38 }
 0x195   :  { %v101_v42 = vadd.f32 %v100_v41, %v69_v40 }
 0x197   :  { %v102_v43 = vmax.f32 %v101_v42, 0.0 }
 0x199   :  { %257 = vmatmul.msk.f32.vlgmr.msra.gmra.mxu1 %vm104_vm6, %v102_v43 }
 0x216   :  { %v125_v45 = vpop.f32.mrf.mxu1 }
 0x217   :  { %v126_v46 = vadd.f32 %v125_v45, %v103_v44 }
 0x219   :  { %v130_v47 = vsel %vm70_vm1, %v126_v46, 0.0 }
 0x21a   :  { %131 = vadd.xlane.f32.xlu1 %v130_v47 }
 0x28d   :  { %v132_v48 = vpop.xlane.xlu1 %131 }
 0x28e   :  { %v133_v49 = vmul.f32 %v132_v48, %v338_v14 }
 0x290   :  { %v134_v50 = vsub.f32 %v126_v46, %v133_v49 }
 0x292   :  { %v135_v51 = vmul.f32 %v134_v50, %v134_v50 }
 0x294   :  { %v136_v52 = vsel %vm70_vm1, %v135_v51, 0.0 }
 0x295   :  { %137 = vadd.xlane.f32.xlu1 %v136_v52 }
 0x308   :  { %v138_v61 = vpop.xlane.xlu1 %137 }
 0x309   :  { %v139_v62 = vmul.f32 %v138_v61, %v338_v14  ;;  %v197_v14 = vstv %s360_s0 }
 0x30a   :  { %v198_v16 = vmul.f32 %v197_v14, %v196_v13 }
 0x30b   :  { %v140_v63 = vadd.f32 1e-05, %v139_v62 }
 0x30d   :  { %270 = vrsqrt.f32 %v140_v63  ;;  %vm147_vm8 = vweird.f32 %v140_v63 }
 0x313   :  { %v271_v0 = vpop.eup %270 }
 0x314   :  { %v142_v1 = vmul.f32 %v271_v0, %v140_v63  ;;  %vm148_vm7 = vweird.f32 %v271_v0 }
 0x315   :  { %vm149_vm9 = vmor %vm147_vm8, %vm148_vm7 }
 0x316   :  { %v143_v2 = vmul.f32 %v271_v0, %v142_v1 }
 0x318   :  { %v144_v3 = vmul.f32 0.5, %v143_v2 }
 0x31a   :  { %v145_v4 = vsub.f32 1.5, %v144_v3 }
 0x31c   :  { %v146_v5 = vmul.f32 %v271_v0, %v145_v4 }
 0x31e   :  { %v150_v6 = vsel %vm149_vm9, %v271_v0, %v146_v5 }
 0x31f   :  { %v151_v8 = vmul.f32 %v150_v6, %v134_v50 }
 0x321   :  { %v152_v10 = vmul.f32 %v151_v8, %v128_v7 }
 0x323   :  { %v153_v11 = vadd.f32 %v152_v10, %v129_v9 }
 0x325   :  { %v154_v12 = vmax.f32 %v153_v11, 0.0 }
 0x327   :  { %258 = vmatmul.msk.f32.vlgmr.msra.gmra.mxu2 %vm104_vm6, %v154_v12 }
 0x3aa   :  { %v184_v17 = vpop.f32.mrf.mxu2 }
 0x3ab   :  { %v185_v18 = vadd.f32 %v184_v17, %v163_v15 }
 0x3ad   :  { %v199_v19 = vadd.f32 %v198_v16, %v185_v18  ;;  %v190_v26 = vsel %vm189_vm11, %v185_v18, -1e+30 }
 0x3ae   :  { %v192_v27 = vsel %vm191_vm10, %v190_v26, -inf }
 0x3af   :  { %v200_v22 = vmax.f32 %v199_v19, 0.0 }
 0x3b1   :  { %v202_v23 = vmul.f32 %v201_v21, %v200_v22 }
 0x3b3   :  { %v203_v25 = vsel %vm191_vm10, %v202_v23, 0.0 }
 0x3b4   :  { %204 = vadd.xlane.f32.xlu2 %v203_v25 }
 0x3bc   :  { %193 = vmax.xlane.f32.xlu2 %v192_v27 }
 0x427   :  { %v205_v30 = vpop.xlane.xlu2 %204 }
 0x428   :  { %v207_v31 = vadd.f32 %v206_v29, %v205_v30 }
 0x42a   :  { %v208_v32 = vmul.f32 0.5, %v207_v31 }
 0x42c   :  { %272 = vtanh.f32 %v208_v32 }
 0x42f   :  { %v194_v39 = vpop.xlane.xlu2 %193 }
 0x430   :  { %v215_v40 = vsub.f32 %v190_v26, %v194_v39 }
 0x432   :  { %v273_v33 = vpop.eup %272 }
 0x433   :  { %v210_v34 = vadd.f32 1.0, %v273_v33 }
 0x435   :  { %v211_v35 = vmul.f32 0.5, %v210_v34 }
 0x437   :  { %v212_v36 = vmul.f32 1.9, %v211_v35 }
 0x439   :  { %v213_v37 = vadd.f32 0.1, %v212_v36 }
 0x43b   :  { %274 = vrcp.f32 %v213_v37  ;;  %245 = vperm.xlu2 %265, %v213_v37  }
 0x441   :  { %v275_v38 = vpop.eup %274 }
 0x442   :  { %218 = vperm.xlu0 %264, %v275_v38  }
 0x495   :  { %v246_v55 = vpop.permute.xlu2 %245 }
 0x496   :  { %v248_v59 = vsel %vm242_vm15, %v246_v55, %v185_v18 }
 0x4b4   :  { %v219_v41 = vpop.permute.xlu0 %218 }
 0x4b5   :  { %v221_v42 = vmul.f32 %v219_v41, %v215_v40 }
 0x4b7   :  { %v222_v43 = vmul.f32 1.442695, %v221_v42 }
 0x4b9   :  { %276 = vpow2.f32 %v222_v43 }
 0x4bf   :  { %v277_v44 = vpop.eup %276 }
 0x4c0   :  { %v224_v45 = vsel %vm191_vm10, %v277_v44, 0.0 }
 0x4c1   :  { %225 = vadd.xlane.f32.xlu1 %v224_v45 }
 0x534   :  { %v226_v46 = vpop.xlane.xlu1 %225 }
 0x535   :  { %278 = vrcp.f32 %v226_v46  ;;  %v238_v50 = vand.u32 2147483648, %v226_v46  ;;  %v236_v52 = vand.u32 2147483647, %v226_v46  ;;  %vm232_vm13 = vweird.f32 %v226_v46 }
 0x537   :  { %v239_v54 = vor.u32 1.1754944e-38, %v238_v50  ;;  %vm237_vm0 = vcmp.eq.f32.partialorder %v236_v52, 8.507059e+37 }
 0x53b   :  { %v279_v47 = vpop.eup %278 }
 0x53c   :  { %v228_v48 = vmul.f32 %v279_v47, %v226_v46  ;;  %vm233_vm12 = vweird.f32 %v279_v47 }
 0x53d   :  { %vm234_vm14 = vmor %vm232_vm13, %vm233_vm12 }
 0x53e   :  { %v229_v49 = vsub.f32 1.0, %v228_v48 }
 0x540   :  { %v230_v51 = vmul.f32 %v279_v47, %v229_v49 }
 0x542   :  { %v231_v53 = vadd.f32 %v279_v47, %v230_v51 }
 0x544   :  { %v235_v56 = vsel %vm234_vm14, %v279_v47, %v231_v53 }
 0x545   :  { %v240_v57 = vsel %vm237_vm0, %v239_v54, %v235_v56 }
 0x546   :  { %v241_v58 = vmul.f32 %v277_v44, %v240_v57 }
 0x548   :  { %v249_v60 = vsel %vm189_vm11, %v241_v58, %v248_v59 }
 0x549   :  { %250 = vst [vmem:[%s363_s3] sm:$0x1] %v249_v60 }
 0x54a   :  { %255 = vsyncpa [#allocation4], 1 }

</bundles_post_ra>
